<compile_context>
chip_gen: v6e
topology: v6e:2x2x1
jax: 0.10.0
libtpu: 0.0.40
codegen_flags: <defaults>
</compile_context>

<pallas_src>
import functools

import jax
import jax.numpy as jnp
from jax import lax
from jax.experimental import pallas as pl
from jax.experimental.pallas import tpu as pltpu


def _round_up(x, m):
    return (x + m - 1) // m * m


def _vae_encoder_kernel(n_layers, latent_dim,
                        x_ref, noise_ref, w_ref, b_ref, z_ref, kl_ref):
    """One batch tile of the VAEEncoder forward.

    x_ref, noise_ref, z_ref : [TM, F] f32 (features zero-padded to F lanes)
    w_ref                   : [n_layers*F, F] bf16 packed weight slab
    b_ref                   : [n_layers, F]   f32  packed bias slab
    kl_ref                  : [TM, 1] f32 per-row KL partial
    """
    F = x_ref.shape[1]
    h = x_ref[...]                               # f32 activations

    for i in range(n_layers):
        w = w_ref[i * F:(i + 1) * F, :]          # static slice -> (F, F) bf16
        b = b_ref[i:i + 1, :]                    # (1, F) f32
        acc = jnp.dot(h.astype(jnp.bfloat16), w,
                      preferred_element_type=jnp.float32)
        h = acc + b
        if i < n_layers - 1:
            h = jnp.maximum(h, 0.0)              # ReLU (input + hidden layers)
        else:
            h = jnp.tanh(h)                      # tanh (output layer)

    # Reparameterization: mu = tanh(enc(x)), sigma = exp(mu), z = mu + sigma*eps.
    # TODO(synk): the N(0,1) sample (self.N.sample) is supplied as a kernel
    # input for determinism; pltpu.prng_* could generate it in-kernel instead.
    mu = h
    sigma = jnp.exp(mu)
    z = mu + sigma * noise_ref[...]
    z_ref[...] = z.astype(z_ref.dtype)

    # KL side-channel (self.kl): sum(sigma^2 + mu^2 - log(sigma) - 1/2).
    # log(sigma) == mu exactly here.  Lane-padding (mu == 0) is masked out.
    lane = lax.broadcasted_iota(jnp.int32, mu.shape, 1)
    kl_el = sigma * sigma + mu * mu - mu - 0.5
    kl_el = jnp.where(lane < latent_dim, kl_el, 0.0)
    kl_ref[...] = jnp.sum(kl_el, axis=-1, keepdims=True)


def vae_encoder_forward(x, noise, enc_params, *, block_batch=256):
    """x: [B, input_dim] f32, noise: [B, latent_dim] f32 (N(0,1) sample).

    Returns (z [B, latent_dim] f32, kl scalar f32)."""
    B, input_dim = x.shape
    latent_dim = noise.shape[-1]
    n_layers = len(enc_params)

    # Common lane-padded feature width (multiple of 128 covering every layer).
    max_dim = max([input_dim, latent_dim] + [W.shape[1] for W, _ in enc_params])
    F = _round_up(max_dim, 128)

    # Batch tile: multiple of 8 sublanes, capped at block_batch.
    tm = min(_round_up(block_batch, 8), _round_up(B, 8))
    b_pad = _round_up(B, tm)

    # ---- pack parameters into one bf16 weight slab + one f32 bias slab ----
    # (In a real serving loop these slabs would be built once and reused.)
    w_blocks, b_rows = [], []
    for (W, b) in enc_params:
        fi, fo = W.shape
        w_blocks.append(jnp.zeros((F, F), jnp.float32).at[:fi, :fo].set(W))
        b_rows.append(jnp.zeros((F,), jnp.float32).at[:fo].set(jnp.reshape(b, (-1,))))
    w_slab = jnp.concatenate(w_blocks, axis=0).astype(jnp.bfloat16)   # [n*F, F]
    b_slab = jnp.stack(b_rows, axis=0)                                # [n, F]

    # ---- lane / batch zero-padding of the activations ----
    x_pad = jnp.pad(x.astype(jnp.float32), ((0, b_pad - B), (0, F - input_dim)))
    n_pad = jnp.pad(noise.astype(jnp.float32), ((0, b_pad - B), (0, F - latent_dim)))

    kernel = functools.partial(_vae_encoder_kernel, n_layers, latent_dim)

    z_pad, kl_rows = pl.pallas_call(
        kernel,
        out_shape=(
            jax.ShapeDtypeStruct((b_pad, F), jnp.float32),
            jax.ShapeDtypeStruct((b_pad, 1), jnp.float32),
        ),
        grid=(b_pad // tm,),
        in_specs=[
            pl.BlockSpec((tm, F), lambda i: (i, 0)),             # x tile
            pl.BlockSpec((tm, F), lambda i: (i, 0)),             # noise tile
            pl.BlockSpec((n_layers * F, F), lambda i: (0, 0)),   # weights (resident)
            pl.BlockSpec((n_layers, F), lambda i: (0, 0)),       # biases  (resident)
        ],
        out_specs=(
            pl.BlockSpec((tm, F), lambda i: (i, 0)),             # z tile (lane-dense)
            pl.BlockSpec((tm, 1), lambda i: (i, 0)),             # per-row KL partial
        ),
        compiler_params=pltpu.CompilerParams(
            dimension_semantics=("parallel",),                   # megacore on v7x
            vmem_limit_bytes=32 * 1024 * 1024,
        ),
    )(x_pad, n_pad, w_slab, b_slab)

    z = z_pad[:B, :latent_dim]
    kl = jnp.sum(kl_rows[:B])
    return z, kl


# ---------------- parameter construction (PyTorch nn.Linear-style init) ----------------
def _init_linear(key, fan_in, fan_out):
    kw, kb = jax.random.split(key)
    bound = 1.0 / float(fan_in) ** 0.5
    W = jax.random.uniform(kw, (fan_in, fan_out), jnp.float32, -bound, bound)
    b = jax.random.uniform(kb, (fan_out,), jnp.float32, -bound, bound)
    return W, b


def build_encoder_params(key, input_dim, latent_dim, hidden):
    keys = jax.random.split(key, len(hidden) + 1)
    params = [_init_linear(keys[0], input_dim, hidden[0])]
    for i in range(1, len(hidden)):
        params.append(_init_linear(keys[i], hidden[i - 1], hidden[i]))
    params.append(_init_linear(keys[-1], hidden[-1], latent_dim))
    return params


# ---------------- pure-JAX reference for correctness checks ----------------
def vae_encoder_reference(x, noise, enc_params, matmul_dtype=jnp.float32):
    h = x
    n = len(enc_params)
    for i, (W, b) in enumerate(enc_params):
        h = jnp.dot(h.astype(matmul_dtype), W.astype(matmul_dtype),
                    preferred_element_type=jnp.float32) + b
        h = jnp.maximum(h, 0.0) if i < n - 1 else jnp.tanh(h)
    mu = h
    sigma = jnp.exp(mu)
    z = mu + sigma * noise
    kl = jnp.sum(sigma ** 2 + mu ** 2 - jnp.log(sigma) - 0.5)
    return z, kl


if __name__ == "__main__":
    batch = 64
    input_dim = 32
    latent_dim = 16
    hidden = [64, 32]

    root = jax.random.PRNGKey(0)
    k_param, k_x, k_noise = jax.random.split(root, 3)

    enc_params = build_encoder_params(k_param, input_dim, latent_dim, hidden)
    x = jax.random.normal(k_x, (batch, input_dim), jnp.float32)
    # Deterministic N(0,1) sample for the reparameterization trick.
    noise = jax.random.normal(k_noise, (batch, latent_dim), jnp.float32)

    # block_batch=32 so the 64-row demo batch exercises a 2-step grid;
    # the production default (256) is used when batch is large.
    z, kl = vae_encoder_forward(x, noise, enc_params, block_batch=32)
    z = jax.block_until_ready(z)
    kl = jax.block_until_ready(kl)

    # Check against a reference using the same bf16-operand / f32-accumulate
    # matmul path (tight tolerance), and against pure f32 (loose sanity check).
    z_ref_bf, kl_ref_bf = vae_encoder_reference(x, noise, enc_params, jnp.bfloat16)
    z_ref_f32, _ = vae_encoder_reference(x, noise, enc_params, jnp.float32)

    assert z.shape == (batch, latent_dim)
    assert jnp.allclose(z, z_ref_bf, atol=5e-3, rtol=5e-3), "z mismatch vs bf16 reference"
    assert jnp.allclose(kl, kl_ref_bf, rtol=1e-2, atol=1e-1), "kl mismatch vs bf16 reference"
    assert jnp.allclose(z, z_ref_f32, atol=6e-2, rtol=6e-2), "z mismatch vs f32 reference"

    print("KERNEL_OK")
</pallas_src>

<mosaic_0001>
module attributes {stable_mosaic.version = 11 : i64} {
  func.func @_vae_encoder_kernel(%arg0: i32, %arg1: memref<32x128xf32, #tpu.memory_space<vmem>>, %arg2: memref<32x128xf32, #tpu.memory_space<vmem>>, %arg3: memref<384x128xbf16, #tpu.memory_space<vmem>>, %arg4: memref<3x128xf32, #tpu.memory_space<vmem>>, %arg5: memref<32x128xf32, #tpu.memory_space<vmem>>, %arg6: memref<32x1xf32, #tpu.memory_space<vmem>>) attributes {dimension_semantics = [#tpu.dimension_semantics<parallel>], iteration_bounds = array<i64: 2>, scalar_prefetch = 0 : i64, scratch_operands = 0 : i64, tpu.core_type = #tpu.core_type<tc>, window_params = [{transform_indices = @transform_0, window_bounds = array<i64: 32, 128>}, {transform_indices = @transform_1, window_bounds = array<i64: 32, 128>}, {pipeline_mode = #tpu.pipeline_mode<synchronous>, transform_indices = @transform_2, window_bounds = array<i64: 384, 128>}, {pipeline_mode = #tpu.pipeline_mode<synchronous>, transform_indices = @transform_3, window_bounds = array<i64: 3, 128>}, {transform_indices = @transform_4, window_bounds = array<i64: 32, 128>}, {transform_indices = @transform_5, window_bounds = array<i64: 32, 1>}]} {
    %c0 = arith.constant 0 : index
    %c0_0 = arith.constant 0 : index
    %0 = vector.load %arg1[%c0, %c0_0] : memref<32x128xf32, #tpu.memory_space<vmem>>, vector<32x128xf32>
    %c0_1 = arith.constant 0 : index
    %c0_2 = arith.constant 0 : index
    %1 = vector.load %arg3[%c0_1, %c0_2] : memref<384x128xbf16, #tpu.memory_space<vmem>>, vector<128x128xbf16>
    %c0_3 = arith.constant 0 : index
    %c0_4 = arith.constant 0 : index
    %2 = vector.load %arg4[%c0_3, %c0_4] : memref<3x128xf32, #tpu.memory_space<vmem>>, vector<1x128xf32>
    %3 = arith.truncf %0 : vector<32x128xf32> to vector<32x128xbf16>
    %cst = arith.constant dense<0.000000e+00> : vector<32x128xf32>
    %4 = tpu.matmul %3, %1, %cst {dimension_numbers = #tpu.dot_dimension_numbers<[1], [0], [0], [1], [0, 0, 1, 1], [], []>} : vector<32x128xbf16>, vector<128x128xbf16>, vector<32x128xf32> -> vector<32x128xf32>
    %5 = vector.broadcast %2 : vector<1x128xf32> to vector<32x128xf32>
    %6 = arith.addf %4, %5 : vector<32x128xf32>
    %cst_5 = arith.constant 0.000000e+00 : f32
    %7 = vector.broadcast %cst_5 : f32 to vector<32x128xf32>
    %8 = arith.maximumf %6, %7 : vector<32x128xf32>
    %c128 = arith.constant 128 : index
    %c0_6 = arith.constant 0 : index
    %9 = vector.load %arg3[%c128, %c0_6] : memref<384x128xbf16, #tpu.memory_space<vmem>>, vector<128x128xbf16>
    %c1 = arith.constant 1 : index
    %c0_7 = arith.constant 0 : index
    %10 = vector.load %arg4[%c1, %c0_7] : memref<3x128xf32, #tpu.memory_space<vmem>>, vector<1x128xf32>
    %11 = arith.truncf %8 : vector<32x128xf32> to vector<32x128xbf16>
    %cst_8 = arith.constant dense<0.000000e+00> : vector<32x128xf32>
    %12 = tpu.matmul %11, %9, %cst_8 {dimension_numbers = #tpu.dot_dimension_numbers<[1], [0], [0], [1], [0, 0, 1, 1], [], []>} : vector<32x128xbf16>, vector<128x128xbf16>, vector<32x128xf32> -> vector<32x128xf32>
    %13 = vector.broadcast %10 : vector<1x128xf32> to vector<32x128xf32>
    %14 = arith.addf %12, %13 : vector<32x128xf32>
    %cst_9 = arith.constant 0.000000e+00 : f32
    %15 = vector.broadcast %cst_9 : f32 to vector<32x128xf32>
    %16 = arith.maximumf %14, %15 : vector<32x128xf32>
    %c256 = arith.constant 256 : index
    %c0_10 = arith.constant 0 : index
    %17 = vector.load %arg3[%c256, %c0_10] : memref<384x128xbf16, #tpu.memory_space<vmem>>, vector<128x128xbf16>
    %c2 = arith.constant 2 : index
    %c0_11 = arith.constant 0 : index
    %18 = vector.load %arg4[%c2, %c0_11] : memref<3x128xf32, #tpu.memory_space<vmem>>, vector<1x128xf32>
    %19 = arith.truncf %16 : vector<32x128xf32> to vector<32x128xbf16>
    %cst_12 = arith.constant dense<0.000000e+00> : vector<32x128xf32>
    %20 = tpu.matmul %19, %17, %cst_12 {dimension_numbers = #tpu.dot_dimension_numbers<[1], [0], [0], [1], [0, 0, 1, 1], [], []>} : vector<32x128xbf16>, vector<128x128xbf16>, vector<32x128xf32> -> vector<32x128xf32>
    %21 = vector.broadcast %18 : vector<1x128xf32> to vector<32x128xf32>
    %22 = arith.addf %20, %21 : vector<32x128xf32>
    %23 = math.tanh %22 : vector<32x128xf32>
    %24 = math.exp %23 : vector<32x128xf32>
    %c0_13 = arith.constant 0 : index
    %c0_14 = arith.constant 0 : index
    %25 = vector.load %arg2[%c0_13, %c0_14] : memref<32x128xf32, #tpu.memory_space<vmem>>, vector<32x128xf32>
    %26 = arith.mulf %24, %25 : vector<32x128xf32>
    %27 = arith.addf %23, %26 : vector<32x128xf32>
    %c0_15 = arith.constant 0 : index
    %c0_16 = arith.constant 0 : index
    %28 = vector.load %arg5[%c0_15, %c0_16] : memref<32x128xf32, #tpu.memory_space<vmem>>, vector<32x128xf32>
    tpu.vector_store %arg5[%c0_15, %c0_16], %27 {strides = array<i32>} : memref<32x128xf32, #tpu.memory_space<vmem>>, vector<32x128xf32>,
    %29 = tpu.iota {dimensions = array<i32: 1>} : vector<32x128xi32>
    %30 = arith.mulf %24, %24 : vector<32x128xf32>
    %31 = arith.mulf %23, %23 : vector<32x128xf32>
    %32 = arith.addf %30, %31 : vector<32x128xf32>
    %33 = arith.subf %32, %23 : vector<32x128xf32>
    %cst_17 = arith.constant 5.000000e-01 : f32
    %34 = vector.broadcast %cst_17 : f32 to vector<32x128xf32>
    %35 = arith.subf %33, %34 : vector<32x128xf32>
    %c16_i32 = arith.constant 16 : i32
    %36 = vector.broadcast %c16_i32 : i32 to vector<32x128xi32>
    %37 = arith.cmpi slt, %29, %36 : vector<32x128xi32>
    %cst_18 = arith.constant 0.000000e+00 : f32
    %38 = vector.broadcast %cst_18 : f32 to vector<32x128xf32>
    %39 = arith.select %37, %35, %38 : vector<32x128xi1>, vector<32x128xf32>
    %cst_19 = arith.constant dense<0.000000e+00> : vector<32xf32>
    %40 = vector.multi_reduction <add>, %39, %cst_19 [1] : vector<32x128xf32> to vector<32xf32>
    %41 = vector.shape_cast %40 : vector<32xf32> to vector<32x1xf32>
    %c0_20 = arith.constant 0 : index
    %c0_21 = arith.constant 0 : index
    %42 = vector.load %arg6[%c0_20, %c0_21] : memref<32x1xf32, #tpu.memory_space<vmem>>, vector<32x1xf32>
    tpu.vector_store %arg6[%c0_20, %c0_21], %41 {strides = array<i32>} : memref<32x1xf32, #tpu.memory_space<vmem>>, vector<32x1xf32>,
    return
  }
  func.func @transform_0(%arg0: i32) -> (i32, i32) {
    %c0_i32 = arith.constant 0 : i32
    %c0_i32_0 = arith.constant 0 : i32
    return %arg0, %c0_i32 : i32, i32
  }
  func.func @transform_1(%arg0: i32) -> (i32, i32) {
    %c0_i32 = arith.constant 0 : i32
    %c0_i32_0 = arith.constant 0 : i32
    return %arg0, %c0_i32 : i32, i32
  }
  func.func @transform_2(%arg0: i32) -> (i32, i32) {
    %c0_i32 = arith.constant 0 : i32
    %c0_i32_0 = arith.constant 0 : i32
    %c0_i32_1 = arith.constant 0 : i32
    return %c0_i32, %c0_i32_0 : i32, i32
  }
  func.func @transform_3(%arg0: i32) -> (i32, i32) {
    %c0_i32 = arith.constant 0 : i32
    %c0_i32_0 = arith.constant 0 : i32
    %c0_i32_1 = arith.constant 0 : i32
    return %c0_i32, %c0_i32_0 : i32, i32
  }
  func.func @transform_4(%arg0: i32) -> (i32, i32) {
    %c0_i32 = arith.constant 0 : i32
    %c0_i32_0 = arith.constant 0 : i32
    return %arg0, %c0_i32 : i32, i32
  }
  func.func @transform_5(%arg0: i32) -> (i32, i32) {
    %c0_i32 = arith.constant 0 : i32
    %c0_i32_0 = arith.constant 0 : i32
    return %arg0, %c0_i32 : i32, i32
  }
}

</mosaic_0001>

<bundles_post_ra>
// kernel: tpu_custom_call.1
= control target key start
LH: loop header
LB: loop body
LE: loop exit
PB: predicated region body
PF: predicated region fallthrough
CT: control target
= control target key end

     0   :  { %s1631_s0 = inlined_call_operand.hbm [shape: f32[64,128], index: 0, kind: input, shape index: {}]   ;;  %s1632_s1 = inlined_call_operand.hbm [shape: f32[64,128], index: 1, kind: input, shape index: {}]   ;;  %s1633_s2 = inlined_call_operand.hbm [shape: bf16[384,128], index: 2, kind: input, shape index: {}]   ;;  %s1634_s3 = inlined_call_operand.vmem [shape: f32[3,128], index: 3, kind: input, shape index: {}]   ;;  %s1635_s4 = inlined_call_operand.hbm [shape: f32[64,128], index: 4, kind: output, shape index: {0}]   ;;  %s1636_s5 = inlined_call_operand.vmem [shape: f32[64,1], index: 5, kind: output, shape index: {1}]  }
   0x1   :  { %1640 = sst [smem:[#allocation13_spill]] %s1631_s0 }
   0x2   :  { %1641 = sst [smem:[#allocation14_spill]] %s1633_s2 }
   0x3   :  { %11 = vsyncpa [#allocation3], 0 }
   0x4   :  { %13 = vsyncpa [#allocation3 + $0x1], 0 }
   0x5   :  { %14 = vsyncpa [#allocation6], 0 }
   0x6   :  { %16 = vsyncpa [#allocation6 + $0x1], 0 }
   0x7   :  { %17 = vsyncpa [#allocation4], 0 }
   0x8   :  { %19 = vsyncpa [#allocation4 + $0x1], 0  ;;  %s1358_s18 = smov 0   ;;  %s1360_s19 = smov 0  }
   0x9   :  { %s1362_s20 = smov 0   ;;  %s1364_s21 = smov 0  }
   0xa LB: > { %s1379_s22 = sadd.s32 4294967295, %s1316_s21   ;;  %s908_s23 = sadd.s32 4294967294, %s1316_s21   ;;  %s1316_s21 = sphi %s1364_s21, %s1660_s21   ;;  %s1312_s20 = sphi %s1362_s20, %s1659_s20   ;;  %s1308_s19 = sphi %s1360_s19, %s1658_s19   ;;  %s1304_s18 = sphi %s1358_s18, %s1657_s18  }
   0xb   : > { %p45_p0 = scmp.ne.s32.totalorder %s1308_s19, %s1304_s18  ;;  %p1637_p1 = scmp.eq.s32.totalorder %s1379_s22, 0 }
   0xc   : > { %p143_p3 = scmp.eq.s32.totalorder %s908_s23, 1  ;;  %p909_p5 = scmp.ge.s32.totalorder %s1316_s21, 1 }
   0xd   : > { %p1388_p4 = por %p1637_p1, %p45_p0  ;;  %p176_p7 = scmp.lt.s32.totalorder %s1316_s21, 3 }
   0xe   : > { %p1393_p6 = por %p143_p3, %p45_p0  ;;  %s1318_s27 = smov [#allocation7]  }
   0xf   : > { %s1642_s24 = scalar_select %p1388_p4, 1, 0 }
  0x10   : > { %s1643_s25 = scalar_select %p1393_p6, 1, 0 }
  0x11   : > { %p1398_p8 = pnand %p909_p5, %p176_p7  ;;  %s188_s28 = sshll.u32 %s1318_s27, 4  ;;  %s189_s28 = int_to_ptr.vmem [resolvable:$true] %s188_s28 }
  0x12   : > { %s1412_s30 = sadd.s32 1, %s1316_s21   ;;  %s32_s6 = sadd.s32 1, %s1312_s20 }
  0x13   : > { %p1064_p9 = pneg %p1398_p8  ;;  %s29_s7 = ssub.s32 %s1316_s21, %s1412_s30 }
  0x14   : > { %s1173_s8 = scalar_lea.vmem %s189_s28, 3072  ;;  %p1181_p5 = scmp.lt.s32.totalorder %s189_s28, %s189_s28 }
  0x15   : > { %p1407_p11 = pnand %p1064_p9, %p1637_p1  ;;  %p1174_p13 = scmp.ne.s32.totalorder %s189_s28, %s1173_s8 }
  0x16   : > { %p1182_p7 = scmp.lt.s32.totalorder %s1173_s8, %s1173_s8 }
  0x17   : > { %p1164_p12 = pneg %p1407_p11 }
  0x18   : > { %p1183_p10 = por %p1182_p7, %p1181_p5 }
  0x19   : > { %p1176_p0 = pnand %p1174_p13, %p1164_p12 }
  0x1b   : > { %p1177_p3 = pneg %p1176_p0 }
  0x1d   : > { %p1184_p2 = pnand %p1183_p10, %p1177_p3 }
  0x1f   : > { %1187 = shalt.err (!%p1184_p2)
}
  0x20   : > { %s1319_s9 = smov 64   ;;  %s1320_s10 = smov 4  }
  0x21   : > { %s1646_s2 = sld [smem:[#allocation14_spill]]  ;;  %p30_p9 = scmp.eq.s32.totalorder %s29_s7, 0 }
  0x22   : > { %p39_p10 = scmp.ne.s32.totalorder %s1312_s20, %s1308_s19  ;;  %p40_p2 = scmp.eq.s32.totalorder %s1316_s21, 0 }
  0x23   : > { %p1080_p12 = scmp.lt.s32.totalorder %s1316_s21, 2  ;;  %p1647_p0 = scmp.eq.s32.totalorder %s1379_s22, 1 }
  0x24   : > { %s1429_s13 = scalar_select %p30_p9, %s1312_s20, %s32_s6  }
  0x25   : > { %p41_p13 = por %p40_p2, %p39_p10  ;;  %p1433_p3 = por %p1647_p0, %p39_p10 }
  0x26   : > { %s205_s15 = sand.u32 1, %s1312_s20   ;;  %s961_s16 = sshll.u32 %s1316_s21, 9 }
  0x27   : > { %1067 = dma.hbm_to_vmem [thread:$0]  (!%p1407_p11), %s1646_s2, 3072, %s189_s28, [#allocation6], %s1319_s9, %s1319_s9, %s1320_s10  }
  0x28   : > { %s1648_s14 = scalar_select %p1433_p3, 1, 0 }
  0x29   : > { %s1439_s17 = sshll.u32 %s205_s15, 5  ;;  %s1649_s0 = sld [smem:[#allocation13_spill]] }
  0x2a   : > { %s209_s29 = scalar_lea.vmem [#allocation2], %s1439_s17  ;;  %p1449_p11 = pnand %p1080_p12, %p41_p13 }
  0x2b   : > { %s216_s6 = sshll.u32 %s209_s29, 4  ;;  %s1455_s8 = scalar_lea.sflag [#allocation3], %s205_s15  ;;  %s1453_s6 = int_to_ptr.vmem [resolvable:$true] %s216_s6 }
  0x2c   : > { %p1190_p7 = pneg %p1449_p11 }
  0x2f   : > { %s1446_s28 = scalar_lea.hbm %s1649_s0, %s961_s16  ;;  %s1193_s12 = scalar_lea.hbm %s1649_s0, 1024 }
  0x30   : > { %s1188_s9 = scalar_lea.hbm %s1446_s28, 512  ;;  %p1194_p2 = scmp.lt.s32.totalorder %s1446_s28, %s1649_s0 }
  0x31   : > { %p1189_p5 = scmp.ne.s32.totalorder %s1446_s28, %s1188_s9  ;;  %p1195_p12 = scmp.lt.s32.totalorder %s1193_s12, %s1188_s9 }
  0x33   : > { %p1191_p9 = pnand %p1190_p7, %p1189_p5  ;;  %p1196_p13 = por %p1195_p12, %p1194_p2 }
  0x35   : > { %p1192_p10 = pneg %p1191_p9 }
  0x37   : > { %p1197_p0 = pnand %p1196_p13, %p1192_p10 }
  0x39   : > { %1200 = shalt.err (!%p1197_p0)
}
  0x3a   : > { %s1201_s15 = scalar_lea.vmem %s1453_s6, 512  ;;  %s1321_s29 = smov [#allocation2]  }
  0x3b   : > { %p1202_p1 = scmp.ne.s32.totalorder %s1453_s6, %s1201_s15  ;;  %s1206_s10 = sshll.u32 %s1321_s29, 4  ;;  %s1207_s10 = int_to_ptr.vmem [resolvable:$false] %s1206_s10 }
  0x3c   : > { %s1208_s11 = scalar_lea.vmem %s1207_s10, 1024  ;;  %p1209_p6 = scmp.lt.s32.totalorder %s1453_s6, %s1207_s10 }
  0x3d   : > { %p1204_p5 = pnand %p1202_p1, %p1190_p7  ;;  %p1210_p3 = scmp.lt.s32.totalorder %s1208_s11, %s1201_s15 }
  0x3f   : > { %p1205_p9 = pneg %p1204_p5  ;;  %p1211_p4 = por %p1210_p3, %p1209_p6 }
  0x41   : > { %p1212_p2 = pnand %p1211_p4, %p1205_p9 }
  0x43   : > { %1215 = shalt.err (!%p1212_p2)
}
  0x44   : > { %s1322_s9 = smov 128   ;;  %s1323_s12 = smov 8  }
  0x45   : > { %1071 = dma.hbm_to_vmem [thread:$0]  (!%p1449_p11), %s1446_s28, 512, %s1453_s6, %s1455_s8, %s1322_s9, %s1322_s9, %s1323_s12  }
  0x46   : > { %s1490_s15 = scalar_lea.hbm %s1632_s1, %s961_s16  ;;  %s230_s29 = scalar_lea.vmem [#allocation5], %s1439_s17 }
  0x47   : > { %s237_s10 = sshll.u32 %s230_s29, 4  ;;  %s226_s11 = sand.u32 1, %s1316_s21   ;;  %s1494_s10 = int_to_ptr.vmem [resolvable:$true] %s237_s10 }
  0x48   : > { %s227_s0 = scalar_lea.sflag [#allocation6], %s226_s11  ;;  %s1216_s2 = scalar_lea.hbm %s1490_s15, 512 }
  0x49   : > { %p1217_p1 = scmp.ne.s32.totalorder %s1490_s15, %s1216_s2  ;;  %s1221_s16 = scalar_lea.hbm %s1632_s1, 1024 }
  0x4a   : > { %p1222_p3 = scmp.lt.s32.totalorder %s1490_s15, %s1632_s1  ;;  %p1223_p10 = scmp.lt.s32.totalorder %s1221_s16, %s1216_s2 }
  0x4b   : > { %p1219_p4 = pnand %p1217_p1, %p1190_p7 }
  0x4c   : > { %p1224_p12 = por %p1223_p10, %p1222_p3 }
  0x4d   : > { %p1220_p6 = pneg %p1219_p4 }
  0x4f   : > { %p1225_p13 = pnand %p1224_p12, %p1220_p6 }
  0x51   : > { %1228 = shalt.err (!%p1225_p13)
}
  0x52   : > { %s1229_s17 = scalar_lea.vmem %s1494_s10, 512  ;;  %s1324_s27 = smov [#allocation5]  }
  0x53   : > { %p1230_p0 = scmp.ne.s32.totalorder %s1494_s10, %s1229_s17  ;;  %s1234_s29 = sshll.u32 %s1324_s27, 4  ;;  %s1235_s29 = int_to_ptr.vmem [resolvable:$false] %s1234_s29 }
  0x54   : > { %s1236_s11 = scalar_lea.vmem %s1235_s29, 1024  ;;  %p1237_p2 = scmp.lt.s32.totalorder %s1494_s10, %s1235_s29 }
  0x55   : > { %p1232_p5 = pnand %p1230_p0, %p1190_p7  ;;  %p1238_p1 = scmp.lt.s32.totalorder %s1236_s11, %s1229_s17 }
  0x57   : > { %p1233_p9 = pneg %p1232_p5  ;;  %p1239_p4 = por %p1238_p1, %p1237_p2 }
  0x59   : > { %p1240_p3 = pnand %p1239_p4, %p1233_p9 }
  0x5b   : > { %1243 = shalt.err (!%p1240_p3)
}
  0x5c   : > { %1074 = dma.hbm_to_vmem [thread:$0]  (!%p1449_p11), %s1490_s15, 512, %s1494_s10, %s227_s0, %s1322_s9, %s1322_s9, %s1323_s12  }
  0x5d   : > { %249 = sbr.rel (%p1398_p8) target bundleno = 929 (0x3a1), region = 36  ;;  %s1524_s2 = sand.u32 (!%p1398_p8), 1, %s1308_s19  }
  0x5e   : > { %s1527_s28 = sshll.u32 (!%p1398_p8), %s1524_s2, 5  ;;  %s252_s6 = scalar_lea.sflag (!%p1398_p8), [#allocation3], %s1524_s2 }
  0x5f   : > { %s1531_s7 = scalar_lea.vmem (!%p1398_p8), [#allocation2], %s1527_s28  ;;  %p1651_p7 = scmp.ne.s32.totalorder (!%p1398_p8), %s1642_s24, 0 }
  0x62   : > { %1287 = dma.done.wait (%p1651_p7), %s252_s6, 512  }
  0x63   : > { %1289 = vsyncadd (%p1651_p7), %s252_s6, 4294966784  ;;  %s260_s0 = sand.u32 1, %s1379_s22   ;;  %s1539_s9 = scalar_lea.vmem [#allocation5], %s1527_s28 }
  0x64   : > { %s261_s26 = scalar_lea.sflag [#allocation6], %s260_s0 }
  0x65   : > { %1291 = dma.done.wait (%p1651_p7), %s261_s26, 512  }
  0x66   : > { %1293 = vsyncadd (%p1651_p7), %s261_s26, 4294966784  ;;  %p1652_p8 = scmp.eq.s32.totalorder %s1379_s22, 0 }
  0x68   : > { %1295 = dma.done.wait (%p1652_p8), [#allocation6], 3072   ;;  %p1653_p11 = pmov %p1652_p8 }
  0x69   : > { %v1122_v0 = vld [vmem:[#allocation7 + $0x38] sm:$0xff]   ;;  %v1123_v1 = vld [vmem:[#allocation7 + $0x30] sm:$0xff]   ;;  %v1124_v2 = vld [vmem:[#allocation7 + $0x28] sm:$0xff]   ;;  %s1567_s23 = scalar_lea.vmem [#allocation8], %s1527_s28  ;;  %s963_s17 = sshll.u32 %s1379_s22, 9 }
  0x6a   : > { %1297 = vsyncadd (%p1653_p11), [#allocation6], 4294964224  ;;  %994 = vmatprep.subr.bf16.mxu0 %v1122_v0  ;;  %v1125_v3 = vld [vmem:[#allocation7 + $0x20] sm:$0xff]   ;;  %v316_v5 = vld [vmem:[%s1531_s7 + $0x8] sm:$0xff]  ;;  %s774_s27 = sshll.u32 %s1567_s23, 4  ;;  %s1582_s28 = scalar_lea.hbm %s1635_s4, %s963_s17  ;;  %s1584_s27 = int_to_ptr.vmem [resolvable:$true] %s774_s27 }
  0x6b   : > { %995 = vmatpush3.bf16.msra.mxu0 %v1122_v0  ;;  %v315_v4 = vld [vmem:[%s1531_s7] sm:$0xff]  ;;  %v1130_v7 = vld [vmem:[#allocation7 + $0x78] sm:$0xff]   ;;  %v1131_v8 = vld [vmem:[#allocation7 + $0x70] sm:$0xff]   ;;  %s756_s6 = scalar_lea.sflag [#allocation4], %s1524_s2  ;;  %p1654_p10 = scmp.ne.s32.totalorder %s1648_s14, 0 }
  0x6c   : > { %996 = vmatprep.subr.bf16.mxu0 %v1123_v1  ;;  %v336_v6 = vpack.c.bf16 %v316_v5, %v315_v4  ;;  %v1126_v9 = vld [vmem:[#allocation7 + $0x18] sm:$0xff]   ;;  %1014 = vmatprep.subr.bf16.mxu1 %v1130_v7  ;;  %v1127_v10 = vld [vmem:[#allocation7 + $0x10] sm:$0xff]   ;;  %v1132_v11 = vld [vmem:[#allocation7 + $0x68] sm:$0xff]   ;;  %s1325_s0 = smov [#allocation8]  }
  0x6d   : > { %1015 = vmatpush3.bf16.msra.mxu1 %v1130_v7  ;;  %v1133_v12 = vld [vmem:[#allocation7 + $0x60] sm:$0xff]   ;;  %v1128_v13 = vld [vmem:[#allocation7 + $0x8] sm:$0xff]   ;;  %v1134_v14 = vld [vmem:[#allocation7 + $0x58] sm:$0xff]   ;;  %s1248_s26 = sshll.u32 %s1325_s0, 4  ;;  %s1249_s26 = int_to_ptr.vmem [resolvable:$false] %s1248_s26 }
  0x6e   : > { %1010 = vmatprep.mubr.bf16.mxu0 %v336_v6  ;;  %1016 = vmatprep.subr.bf16.mxu1 %v1131_v8  ;;  %v1129_v15 = vld [vmem:[#allocation7] sm:$0xff]   ;;  %v317_v16 = vld [vmem:[%s1531_s7 + $0x10] sm:$0xff]  ;;  %v318_v17 = vld [vmem:[%s1531_s7 + $0x18] sm:$0xff]  ;;  %s1244_s7 = scalar_lea.vmem %s1584_s27, 512  ;;  %p1251_p0 = scmp.lt.s32.totalorder %s1584_s27, %s1249_s26 }
  0x6f   : > { %997 = vmatpush3.bf16.msra.mxu0 %v1123_v1  ;;  %v337_v18 = vpack.c.bf16 %v318_v17, %v317_v16  ;;  %v1135_v19 = vld [vmem:[#allocation7 + $0x50] sm:$0xff]   ;;  %v1136_v20 = vld [vmem:[#allocation7 + $0x48] sm:$0xff]   ;;  %v1137_v21 = vld [vmem:[#allocation7 + $0x40] sm:$0xff]   ;;  %p1245_p6 = scmp.ne.s32.totalorder %s1584_s27, %s1244_s7 }
  0x70   : > { %998 = vmatprep.subr.bf16.mxu0 %v1124_v2  ;;  %v1138_v22 = vld [vmem:[#allocation7 + $0xb8] sm:$0xff]   ;;  %v1139_v23 = vld [vmem:[#allocation7 + $0xb0] sm:$0xff]   ;;  %v1140_v24 = vld [vmem:[#allocation7 + $0xa8] sm:$0xff]  }
  0x71   : > { %1017 = vmatpush3.bf16.msra.mxu1 %v1131_v8  ;;  %v1141_v25 = vld [vmem:[#allocation7 + $0xa0] sm:$0xff]   ;;  %v1142_v26 = vld [vmem:[#allocation7 + $0x98] sm:$0xff]   ;;  %v1143_v42 = vld [vmem:[#allocation7 + $0x90] sm:$0xff]   ;;  %p1246_p12 = pnand %p1245_p6, %p1654_p10 }
  0x72   : > { %1018 = vmatprep.subr.bf16.mxu1 %v1132_v11  ;;  %v925_v29 = vld [vmem:[%s1634_s3] ss:$0 sm:$0xff]  ;;  %v1144_v43 = vld [vmem:[#allocation7 + $0x88] sm:$0xff]   ;;  %v934_v47 = vld [vmem:[%s1634_s3 + $0x1] ss:$0 sm:$0xff] }
  0x73   : > { %999 = vmatpush3.bf16.msra.mxu0 %v1124_v2  ;;  %v1145_v44 = vld [vmem:[#allocation7 + $0x80] sm:$0xff]   ;;  %p1247_p13 = pneg %p1246_p12 }
  0x74   : > { %1000 = vmatprep.subr.bf16.mxu0 %v1125_v3  ;;  %v943_v60 = vld [vmem:[%s1634_s3 + $0x2] ss:$0 sm:$0xff] }
  0x75   : > { %1019 = vmatpush3.bf16.msra.mxu1 %v1132_v11  ;;  %v699_v16 = vld [vmem:[%s1539_s9] sm:$0xff] }
  0x76   : > { %1020 = vmatprep.subr.bf16.mxu1 %v1133_v12 }
  0x77   : > { %1001 = vmatpush3.bf16.msra.mxu0 %v1125_v3 }
  0x78   : > { %1002 = vmatprep.subr.bf16.mxu0 %v1126_v9 }
  0x79   : > { %1021 = vmatpush3.bf16.msra.mxu1 %v1133_v12 }
  0x7a   : > { %1022 = vmatprep.subr.bf16.mxu1 %v1134_v14 }
  0x7b   : > { %1003 = vmatpush3.bf16.msra.mxu0 %v1126_v9 }
  0x7c   : > { %1004 = vmatprep.subr.bf16.mxu0 %v1127_v10 }
  0x7d   : > { %1023 = vmatpush3.bf16.msra.mxu1 %v1134_v14  ;;  %v701_v14 = vld [vmem:[%s1539_s9 + $0x10] sm:$0xff] }
  0x7e   : > { %1024 = vmatprep.subr.bf16.mxu1 %v1135_v19 }
  0x7f   : > { %1005 = vmatpush3.bf16.msra.mxu0 %v1127_v10 }
  0x80   : > { %1006 = vmatprep.subr.bf16.mxu0 %v1128_v13 }
  0x81   : > { %1025 = vmatpush3.bf16.msra.mxu1 %v1135_v19 }
  0x82   : > { %1026 = vmatprep.subr.bf16.mxu1 %v1136_v20 }
  0x83   : > { %1007 = vmatpush3.bf16.msra.mxu0 %v1128_v13  ;;  %v715_v13 = vlaneseq }
  0x84   : > { %1008 = vmatprep.subr.bf16.mxu0 %v1129_v15 }
  0x85   : > { %1027 = vmatpush3.bf16.msra.mxu1 %v1136_v20 }
  0x86   : > { %1028 = vmatprep.subr.bf16.mxu1 %v1137_v21 }
  0x87   : > { %1009 = vmatpush3.bf16.msra.mxu0 %v1129_v15 }
  0x88   : > { %1034 = vmatprep.subr.bf16.mxu0 %v1138_v22 }
  0x89   : > { %1029 = vmatpush3.bf16.msra.mxu1 %v1137_v21  ;;  %v716_v21 = vand.u32 127, %v715_v13 }
  0x8a   : > { %1011 = vmatmul.mubr.bf16.vlgmr.msra.gmra.mxu0 %v337_v18 }
  0x8b   : > { %1035 = vmatpush3.bf16.msra.mxu0 %v1138_v22  ;;  %vm737_vm0 = vcmp.lt.s32.totalorder %v716_v21, 16 }
  0x8c   : > { %1036 = vmatprep.subr.bf16.mxu0 %v1139_v23 }
  0x8f   : > { %1037 = vmatpush3.bf16.msra.mxu0 %v1139_v23  ;;  %v702_v23 = vld [vmem:[%s1539_s9 + $0x18] sm:$0xff] }
  0x90   : > { %1038 = vmatprep.subr.bf16.mxu0 %v1140_v24 }
  0x93   : > { %1039 = vmatpush3.bf16.msra.mxu0 %v1140_v24 }
  0x94   : > { %1040 = vmatprep.subr.bf16.mxu0 %v1141_v25 }
  0x97   : > { %1041 = vmatpush3.bf16.msra.mxu0 %v1141_v25 }
  0x98   : > { %1042 = vmatprep.subr.bf16.mxu0 %v1142_v26 }
  0x9b   : > { %1043 = vmatpush3.bf16.msra.mxu0 %v1142_v26 }
  0x9c   : > { %1044 = vmatprep.subr.bf16.mxu0 %v1143_v42 }
  0x9f   : > { %1045 = vmatpush3.bf16.msra.mxu0 %v1143_v42 }
  0xa0   : > { %1046 = vmatprep.subr.bf16.mxu0 %v1144_v43 }
  0xa3   : > { %1047 = vmatpush3.bf16.msra.mxu0 %v1144_v43 }
  0xa4   : > { %1048 = vmatprep.subr.bf16.mxu0 %v1145_v44 }
  0xa7   : > { %1049 = vmatpush3.bf16.msra.mxu0 %v1145_v44 }
 0x14a   : > { %v1012_v27 = vpop.f32.mrf.mxu0 }
 0x14b   : > { %v433_v33 = vadd.f32 %v1012_v27, %v925_v29 }
 0x14c   : > { %v424_v28 = vpop.f32.mrf.mxu0 }
 0x14d   : > { %v425_v31 = vadd.f32 %v925_v29, %v424_v28  ;;  %v441_v39 = vmax.f32 %v433_v33, 0.0  ;;  %v700_v33 = vld [vmem:[%s1539_s9 + $0x8] sm:$0xff]  ;;  %s1250_s9 = scalar_lea.vmem %s1249_s26, 1024 }
 0x14e   : > { %v1013_v30 = vpop.f32.mrf.mxu0  ;;  %p1252_p5 = scmp.lt.s32.totalorder %s1250_s9, %s1244_s7 }
 0x14f   : > { %v436_v32 = vadd.f32 %v1013_v30, %v925_v29  ;;  %v439_v37 = vmax.f32 %v425_v31, 0.0 }
 0x150   : > { %v427_v34 = vpop.f32.mrf.mxu0  ;;  %p1253_p9 = por %p1252_p5, %p1251_p0 }
 0x151   : > { %v428_v35 = vadd.f32 %v925_v29, %v427_v34  ;;  %v442_v36 = vmax.f32 %v436_v32, 0.0 }
 0x152   : > { %p1254_p2 = pnand %p1253_p9, %p1247_p13 }
 0x153   : > { %v440_v38 = vmax.f32 %v428_v35, 0.0  ;;  %v461_v41 = vpack.c.bf16 %v442_v36, %v441_v39 }
 0x155   : > { %v460_v40 = vpack.c.bf16 %v440_v38, %v439_v37 }
 0x157   : > { %1030 = vmatprep.mubr.bf16.mxu1 %v460_v40 }
 0x158   : > { %1031 = vmatmul.mubr.bf16.vlgmr.msra.gmra.mxu1 %v461_v41 }
 0x218   : > { %v1032_v45 = vpop.f32.mrf.mxu1 }
 0x219   : > { %v557_v51 = vadd.f32 %v1032_v45, %v934_v47 }
 0x21a   : > { %v548_v46 = vpop.f32.mrf.mxu1 }
 0x21b   : > { %v549_v49 = vadd.f32 %v934_v47, %v548_v46  ;;  %v565_v57 = vmax.f32 %v557_v51, 0.0 }
 0x21c   : > { %v1033_v48 = vpop.f32.mrf.mxu1 }
 0x21d   : > { %v560_v50 = vadd.f32 %v1033_v48, %v934_v47  ;;  %v563_v55 = vmax.f32 %v549_v49, 0.0 }
 0x21e   : > { %v551_v52 = vpop.f32.mrf.mxu1 }
 0x21f   : > { %v552_v53 = vadd.f32 %v934_v47, %v551_v52  ;;  %v566_v54 = vmax.f32 %v560_v50, 0.0 }
 0x221   : > { %v564_v56 = vmax.f32 %v552_v53, 0.0  ;;  %v585_v59 = vpack.c.bf16 %v566_v54, %v565_v57 }
 0x223   : > { %v584_v58 = vpack.c.bf16 %v564_v56, %v563_v55 }
 0x225   : > { %1050 = vmatprep.mubr.bf16.mxu0 %v584_v58 }
 0x226   : > { %1051 = vmatmul.mubr.bf16.vlgmr.msra.gmra.mxu0 %v585_v59 }
 0x2e6   : > { %v1052_v61 = vpop.f32.mrf.mxu0 }
 0x2e7   : > { %v681_v62 = vadd.f32 %v1052_v61, %v943_v60 }
 0x2e8   : > { %v672_v63 = vpop.f32.mrf.mxu0 }
 0x2e9   : > { %1146 = vtanh.f32 %v681_v62  ;;  %v673_v0 = vadd.f32 %v943_v60, %v672_v63 }
 0x2ea   : > { %v1053_v1 = vpop.f32.mrf.mxu0 }
 0x2eb   : > { %1148 = vtanh.f32 %v673_v0  ;;  %v684_v2 = vadd.f32 %v1053_v1, %v943_v60 }
 0x2ec   : > { %v675_v3 = vpop.f32.mrf.mxu0 }
 0x2ed   : > { %1150 = vtanh.f32 %v684_v2  ;;  %v676_v4 = vadd.f32 %v943_v60, %v675_v3 }
 0x2ef   : > { %1152 = vtanh.f32 %v676_v4 }
 0x2f6   : > { %v1147_v5 = vpop.eup %1146 }
 0x2f7   : > { %v695_v6 = vmul.f32 1.442695, %v1147_v5  ;;  %v723_v18 = vmul.f32 %v1147_v5, %v1147_v5 }
 0x2f8   : > { %v1149_v7 = vpop.eup %1148 }
 0x2f9   : > { %1154 = vpow2.f32 %v695_v6  ;;  %v691_v8 = vmul.f32 1.442695, %v1149_v7  ;;  %v721_v22 = vmul.f32 %v1149_v7, %v1149_v7 }
 0x2fa   : > { %v1151_v9 = vpop.eup %1150 }
 0x2fb   : > { %1156 = vpow2.f32 %v691_v8  ;;  %v697_v10 = vmul.f32 1.442695, %v1151_v9  ;;  %v724_v29 = vmul.f32 %v1151_v9, %v1151_v9 }
 0x2fc   : > { %v1153_v11 = vpop.eup %1152 }
 0x2fd   : > { %1158 = vpow2.f32 %v697_v10  ;;  %v693_v12 = vmul.f32 1.442695, %v1153_v11  ;;  %v722_v36 = vmul.f32 %v1153_v11, %v1153_v11 }
 0x2ff   : > { %1160 = vpow2.f32 %v693_v12 }
 0x306   : > { %v1155_v15 = vpop.eup %1154 }
 0x307   : > { %v719_v17 = vmul.f32 %v1155_v15, %v1155_v15  ;;  %v705_v19 = vmul.f32 %v1155_v15, %v701_v14 }
 0x308   : > { %v1157_v20 = vpop.eup %1156 }
 0x309   : > { %v727_v24 = vadd.f32 %v723_v18, %v719_v17  ;;  %v717_v25 = vmul.f32 %v1157_v20, %v1157_v20  ;;  %v703_v26 = vmul.f32 %v1157_v20, %v699_v16  ;;  %v709_v27 = vadd.f32 %v1147_v5, %v705_v19 }
 0x30a   : > { %v1159_v28 = vpop.eup %1158 }
 0x30b   : > { %v731_v30 = vsub.f32 %v727_v24, %v1147_v5  ;;  %v725_v31 = vadd.f32 %v721_v22, %v717_v25  ;;  %v720_v32 = vmul.f32 %v1159_v28, %v1159_v28  ;;  %v706_v34 = vmul.f32 %v1159_v28, %v702_v23  ;;  %713 = vst [vmem:[%s1567_s23 + $0x10] sm:$0xff] %v709_v27 }
 0x30c   : > { %v1161_v35 = vpop.eup %1160  ;;  %v707_v37 = vadd.f32 %v1149_v7, %v703_v26 }
 0x30d   : > { %v954_v38 = vadd.f32 -0.5, %v731_v30  ;;  %v729_v39 = vsub.f32 %v725_v31, %v1149_v7  ;;  %v728_v40 = vadd.f32 %v724_v29, %v720_v32  ;;  %v718_v41 = vmul.f32 %v1161_v35, %v1161_v35 }
 0x30e   : > { %v704_v42 = vmul.f32 %v1161_v35, %v700_v33  ;;  %v710_v43 = vadd.f32 %v1151_v9, %v706_v34  ;;  %711 = vst [vmem:[%s1567_s23] sm:$0xff] %v707_v37 }
 0x30f   : > { %v740_v44 = vsel %vm737_vm0, %v954_v38, 0.0  ;;  %v952_v45 = vadd.f32 -0.5, %v729_v39  ;;  %v732_v46 = vsub.f32 %v728_v40, %v1151_v9  ;;  %v726_v47 = vadd.f32 %v722_v36, %v718_v41 }
 0x310   : > { %746 = vadd.xlane.f32.xlu1 %v740_v44  ;;  %v708_v48 = vadd.f32 %v1153_v11, %v704_v42  ;;  %714 = vst [vmem:[%s1567_s23 + $0x18] sm:$0xff] %v710_v43 }
 0x311   : > { %v738_v49 = vsel %vm737_vm0, %v952_v45, 0.0  ;;  %v955_v50 = vadd.f32 -0.5, %v732_v46  ;;  %v730_v51 = vsub.f32 %v726_v47, %v1153_v11 }
 0x312   : > { %742 = vadd.xlane.f32.xlu0 %v738_v49  ;;  %712 = vst [vmem:[%s1567_s23 + $0x8] sm:$0xff] %v708_v48 }
 0x313   : > { %v741_v52 = vsel %vm737_vm0, %v955_v50, 0.0  ;;  %v953_v53 = vadd.f32 -0.5, %v730_v51 }
 0x314   : > { %748 = vadd.xlane.f32.xlu1 %v741_v52 }
 0x315   : > { %v739_v54 = vsel %vm737_vm0, %v953_v53, 0.0 }
 0x316   : > { %744 = vadd.xlane.f32.xlu0 %v739_v54 }
 0x317   : > { %1257 = shalt.err (!%p1254_p2)
}
 0x318   : > { %s1258_s24 = scalar_lea.hbm %s1582_s28, 512  ;;  %s1262_s10 = scalar_lea.hbm %s1635_s4, 1024 }
 0x319   : > { %p1259_p1 = scmp.ne.s32.totalorder %s1582_s28, %s1258_s24  ;;  %p1263_p7 = scmp.lt.s32.totalorder %s1582_s28, %s1635_s4 }
 0x31a   : > { %p1264_p8 = scmp.lt.s32.totalorder %s1262_s10, %s1258_s24 }
 0x31b   : > { %p1260_p4 = pnand %p1259_p1, %p1654_p10 }
 0x31c   : > { %p1265_p11 = por %p1264_p8, %p1263_p7 }
 0x31d   : > { %p1261_p3 = pneg %p1260_p4 }
 0x31f   : > { %p1266_p6 = pnand %p1265_p11, %p1261_p3 }
 0x321   : > { %1269 = shalt.err (!%p1266_p6)
}
 0x322   : > { %s1326_s23 = smov 128   ;;  %s1327_s17 = smov 8   ;;  %vm750_vm1 = vcmask 7168  }
 0x323   : > { %1062 = dma.vmem_to_hbm [thread:$0]  (%p1654_p10), %s1584_s27, 512, %s1582_s28, %s756_s6, %s1326_s23, %s1326_s23, %s1327_s17  }
 0x324   : > { %s923_s29 = sshll.u32 %s1379_s22, 2 }
 0x325   : > { %p309_p12 = scmp.lt.s32.totalorder %s923_s29, 7 }
 0x327   : > { %s1662_s29 = smov (!%p309_p12, %s923_s29), 7 }
 0x328   : > { %s924_s11 = sshll.u32 %s1662_s29, 3 }
 0x329   : > { %s312_s26 = scalar_lea.vmem %s1636_s5, %s924_s11 }
 0x399   : > { %v747_v55 = vpop.xlane.xlu1 %746 }
 0x39a   : > { %753 = vst.msk [vmem:[%s312_s26 + $0x10] sm:$0xff] %vm750_vm1, %v747_v55 }
 0x39b   : > { %v743_v56 = vpop.xlane.xlu0 %742 }
 0x39c   : > { %751 = vst.msk [vmem:[%s312_s26] sm:$0xff] %vm750_vm1, %v743_v56 }
 0x39d   : > { %v749_v58 = vpop.xlane.xlu1 %748 }
 0x39e   : > { %754 = vst.msk [vmem:[%s312_s26 + $0x18] sm:$0xff] %vm750_vm1, %v749_v58 }
 0x39f   : > { %v745_v57 = vpop.xlane.xlu0 %744 }
 0x3a0   : > { %752 = vst.msk [vmem:[%s312_s26 + $0x8] sm:$0xff] %vm750_vm1, %v745_v57 }
 0x3a1 PF: > { %s793_s22 = sand.u32 1, %s1304_s18   ;;  %p1655_p10 = scmp.ne.s32.totalorder %s1643_s25, 0 }
 0x3a2   : > { %p1656_p13 = scmp.ge.s32.totalorder %s1316_s21, 2  ;;  %s794_s14 = scalar_lea.sflag [#allocation4], %s793_s22 }
 0x3a4   : > { %p1076_p0 = pnand %p1656_p13, %p1655_p10 }
 0x3a6   : > { %p1077_p5 = pneg %p1076_p0 }
 0x3a8   : > { %1299 = dma.done.wait (%p1077_p5), %s794_s14, 512  }
 0x3a9   : > { %1301 = vsyncadd (%p1077_p5), %s794_s14, 4294966784  ;;  %p22_p9 = scmp.ge.s32.totalorder %s1412_s30, 4   ;;  %s1657_s18 = smov %s1308_s19 }
 0x3aa   : > { %s1658_s19 = smov %s1312_s20  ;;  %s1659_s20 = smov %s1429_s13 }
 0x3ab   : > { %s1660_s21 = smov %s1412_s30  ;;  %24 = sbr.rel (!%p22_p9) target bundleno = 10 (0xa), region = 110 }
 0x3b0   :  { %807 = vsyncpa [#allocation3], 1 }
 0x3b1   :  { %809 = vsyncpa [#allocation3 + $0x1], 1 }
 0x3b2   :  { %810 = vsyncpa [#allocation6], 1 }
 0x3b3   :  { %812 = vsyncpa [#allocation6 + $0x1], 1 }
 0x3b4   :  { %813 = vsyncpa [#allocation4], 1 }
 0x3b5   :  { %815 = vsyncpa [#allocation4 + $0x1], 1 }

</bundles_post_ra>
